<compile_context>
chip_gen: v5e
topology: v5e:2x2
jax: 0.10.0
libtpu: 0.0.40
codegen_flags: <defaults>
</compile_context>

<pallas_src>
import functools
import math

import jax
import jax.numpy as jnp
from jax.experimental import pallas as pl
from jax.experimental.pallas import tpu as pltpu


_COMPUTE_DTYPE = jnp.bfloat16     # MXU-native on v5e / v6e / v7x
_MIN_VMEM_LIMIT = 16 << 20        # never set the scoped limit below the v5e default
_VMEM_MARGIN = 4 << 20            # headroom for temps / internal scratch


def _vmem_budget_bytes():
    """VMEM budget for block residency; defaults to the smallest part (v7x, 64 MiB)."""
    try:
        cap = pltpu.get_tpu_info().vmem_capacity_bytes
    except Exception:
        cap = 64 << 20
    return int(cap * 0.75)


# ---------------------------------------------------------------------------
# Tiling helper
# ---------------------------------------------------------------------------
def _pick_tile(dim, target, align):
    """Largest tile <= target that divides dim and is align-aligned, else full dim."""
    if dim <= target:
        return dim
    for t in range(target, align - 1, -1):
        if dim % t == 0 and t % align == 0:
            return t
    return dim


# ---------------------------------------------------------------------------
# Kernel 1: tiled fused linear  y_i = x @ W_i + b_i  (shared x block, i = 0..n-1)
# ---------------------------------------------------------------------------
def _fused_linear_kernel(*refs, n_out):
    # refs: x, w_0..w_{n-1}, b_0..b_{n-1}, o_0..o_{n-1}, acc_0..acc_{n-1}
    x_ref = refs[0]
    w_refs = refs[1:1 + n_out]
    b_refs = refs[1 + n_out:1 + 2 * n_out]
    o_refs = refs[1 + 2 * n_out:1 + 3 * n_out]
    acc_refs = refs[1 + 3 * n_out:]

    k_idx = pl.program_id(2)
    x = x_ref[...]                                   # (tm, tk) bf16, shared across outputs
    partials = [jnp.dot(x, w_ref[...], preferred_element_type=jnp.float32)
                for w_ref in w_refs]

    # No separate zero-init pass: first K step overwrites, later steps accumulate.
    @pl.when(k_idx == 0)
    def _first():
        for acc, part in zip(acc_refs, partials):
            acc[...] = part

    @pl.when(k_idx > 0)
    def _accumulate():
        for acc, part in zip(acc_refs, partials):
            acc[...] += part

    @pl.when(k_idx == pl.num_programs(2) - 1)
    def _finalize():
        for b_ref, o_ref, acc in zip(b_refs, o_refs, acc_refs):
            o_ref[...] = (acc[...] + b_ref[...].astype(jnp.float32)).astype(o_ref.dtype)


def fused_linear(x, weights, biases, *, out_dtype=None, tm=256, tn=512, tk=512):
    """x: (M, K); weights: seq of (K, N); biases: seq of (N,) f32 -> tuple of (M, N)."""
    M, K = x.shape
    N = weights[0].shape[1]
    n_out = len(weights)
    out_dtype = out_dtype or x.dtype

    xb = jnp.dtype(x.dtype).itemsize
    wb = jnp.dtype(weights[0].dtype).itemsize
    ob = jnp.dtype(out_dtype).itemsize
    sub_align = 16 if xb == 2 else 8                 # bf16 packs 16 rows per sublane tile

    tm = _pick_tile(M, tm, sub_align)
    tn = _pick_tile(N, tn, 128)
    tk = _pick_tile(K, tk, 128)
    grid = (M // tm, N // tn, K // tk)

    x_spec = pl.BlockSpec((tm, tk), lambda i, j, k: (i, k))
    w_spec = pl.BlockSpec((tk, tn), lambda i, j, k: (k, j))
    b_spec = pl.BlockSpec((1, tn), lambda i, j, k: (0, j))
    o_spec = pl.BlockSpec((tm, tn), lambda i, j, k: (i, j))

    # Actual per-step VMEM (double-buffered blocks + f32 accumulators) + margin.
    vmem_bytes = (2 * tm * tk * xb
                  + n_out * (2 * tk * tn * wb + 2 * tn * 4
                             + 2 * tm * tn * ob + tm * tn * 4))
    vmem_limit = int(min(128 << 20, max(_MIN_VMEM_LIMIT, vmem_bytes + _VMEM_MARGIN)))

    flops = 2 * M * N * K * n_out
    bytes_accessed = M * K * xb + n_out * (K * N * wb + N * 4 + M * N * ob)

    kernel = functools.partial(_fused_linear_kernel, n_out=n_out)
    outs = pl.pallas_call(
        kernel,
        grid=grid,
        in_specs=[x_spec] + [w_spec] * n_out + [b_spec] * n_out,
        out_specs=tuple([o_spec] * n_out),
        out_shape=tuple(jax.ShapeDtypeStruct((M, N), out_dtype) for _ in range(n_out)),
        scratch_shapes=[pltpu.VMEM((tm, tn), jnp.float32) for _ in range(n_out)],
        compiler_params=pltpu.CompilerParams(
            dimension_semantics=("parallel", "parallel", "arbitrary"),
            vmem_limit_bytes=vmem_limit),
        cost_estimate=pl.CostEstimate(
            flops=int(flops), transcendentals=0, bytes_accessed=int(bytes_accessed)),
    )(x, *weights, *[b.reshape(1, -1) for b in biases])
    return tuple(outs)


# ---------------------------------------------------------------------------
# Kernel 2: attention over all heads of one batch / q-tile, [B, S, H] layout.
#   energy_h = Q_h K_h^T (1/sqrt(head_dim) folded into Wq); attn = softmax;
#   ctx_h = attn_h V_h, written incrementally into a f32 VMEM scratch.
# ---------------------------------------------------------------------------
def _mha_attention_kernel(q_ref, k_ref, v_ref, *refs, n_heads, head_dim, need_weights):
    if need_weights:
        ctx_ref, attn_ref, ctx_acc = refs
    else:
        ctx_ref, ctx_acc = refs
        attn_ref = None

    q = q_ref[0]                       # (tq, H) bf16 — scale already folded into Wq
    k = k_ref[0]                       # (Sk, H) bf16
    v = v_ref[0]                       # (Sk, H) bf16

    for h in range(n_heads):           # static unroll; live values bounded to one head
        lo = h * head_dim
        hi = lo + head_dim
        qh = q[:, lo:hi]               # (tq, D)
        kh = k[:, lo:hi]               # (Sk, D)
        vh = v[:, lo:hi]               # (Sk, D)

        # NT matmul: contract head_dim of both operands — no k.T materialized.
        energy = jax.lax.dot_general(
            qh, kh, (((1,), (1,)), ((), ())),
            preferred_element_type=jnp.float32)          # (tq, Sk) f32

        m = jnp.max(energy, axis=-1, keepdims=True)
        p = jnp.exp(energy - m)
        denom = jnp.sum(p, axis=-1, keepdims=True)
        attn = p * pl.reciprocal(denom, approx=True)     # EUP recip + VPU mul

        if attn_ref is not None:
            # Lane-dense (tq, Sk) store per head, in the narrow compute dtype.
            attn_ref[0, h] = attn.astype(attn_ref.dtype)

        # Write this head's context into the f32 scratch at its static lane
        # offset immediately: no late concat, no nh-way live partial contexts.
        ctx_acc[:, lo:hi] = jnp.dot(attn.astype(vh.dtype), vh,
                                    preferred_element_type=jnp.float32)

    # Single lane-dense cast+store of all heads directly in (B, Sq, H) layout.
    ctx_ref[0] = ctx_acc[...].astype(ctx_ref.dtype)


def mha_attention(q, k, v, *, n_heads, need_weights=True, weights_dtype=None,
                  tq_target=256):
    """q: (B, Sq, H), k/v: (B, Sk, H) -> (ctx (B, Sq, H), attn (B, nh, Sq, Sk) or None)."""
    B, Sq, H = q.shape
    Sk = k.shape[1]
    head_dim = H // n_heads
    weights_dtype = weights_dtype or q.dtype

    qb = jnp.dtype(q.dtype).itemsize
    kb = jnp.dtype(k.dtype).itemsize
    cb = qb                                            # ctx stored in the compute dtype
    ab = jnp.dtype(weights_dtype).itemsize
    sub_align = 16 if qb == 2 else 8

    # --- VMEM-budget-driven q-tile selection (targets v7x's 64 MiB) ------------
    budget = _vmem_budget_bytes()
    # bytes that scale with tq: double-buffered q/ctx(/attn) blocks + f32 ctx
    # scratch + one head's f32 energy/p/attn temps.
    per_row = (2 * H * qb + 2 * H * cb + H * 4 + 3 * Sk * 4
               + (2 * n_heads * Sk * ab if need_weights else 0))
    # bytes independent of tq: K and V (DMA'd once per batch, still double-buffered).
    fixed = 2 * 2 * Sk * H * kb

    cands = [t for t in range(min(Sq, tq_target), 0, -1)
             if Sq % t == 0 and (t % sub_align == 0 or t == Sq)]
    cands = cands or [Sq]
    tq = next((t for t in cands if fixed + t * per_row <= budget), cands[-1])
    # TODO(synk): if even the smallest tq exceeds the budget (very long Sk on v7x),
    # switch to a flash-style Sk-blocked reduction (requires need_weights=False).

    # v7x has 2 TensorCores: avoid a degenerate 1x1 grid when B == 1.
    if B == 1 and Sq // tq < 2:
        smaller = [t for t in cands if t < tq]
        if smaller:
            tq = smaller[0]

    grid = (B, Sq // tq)
    vmem_limit = int(min(128 << 20,
                         max(_MIN_VMEM_LIMIT, fixed + tq * per_row + _VMEM_MARGIN)))

    # K/V block index is independent of the INNERMOST q-tile axis `i`, so the
    # pipeline skips their DMA between consecutive steps: K/V are fetched once
    # per batch.  Do NOT reorder the grid axes or make these depend on `i`.
    in_specs = [
        pl.BlockSpec((1, tq, H), lambda b, i: (b, i, 0)),
        pl.BlockSpec((1, Sk, H), lambda b, i: (b, 0, 0)),
        pl.BlockSpec((1, Sk, H), lambda b, i: (b, 0, 0)),
    ]
    ctx_spec = pl.BlockSpec((1, tq, H), lambda b, i: (b, i, 0))
    ctx_shape = jax.ShapeDtypeStruct((B, Sq, H), q.dtype)
    if need_weights:
        out_specs = (ctx_spec,
                     pl.BlockSpec((1, n_heads, tq, Sk), lambda b, i: (b, 0, i, 0)))
        out_shape = (ctx_shape,
                     jax.ShapeDtypeStruct((B, n_heads, Sq, Sk), weights_dtype))
    else:
        out_specs = ctx_spec
        out_shape = ctx_shape

    flops = 4 * B * Sq * Sk * H                        # QK^T + attn@V over all heads
    bytes_accessed = (B * Sq * H * qb + 2 * B * Sk * H * kb + B * Sq * H * cb
                      + (B * n_heads * Sq * Sk * ab if need_weights else 0))

    kernel = functools.partial(_mha_attention_kernel, n_heads=n_heads,
                               head_dim=head_dim, need_weights=need_weights)
    out = pl.pallas_call(
        kernel,
        grid=grid,
        in_specs=in_specs,
        out_specs=out_specs,
        out_shape=out_shape,
        scratch_shapes=[pltpu.VMEM((tq, H), jnp.float32)],
        compiler_params=pltpu.CompilerParams(
            dimension_semantics=("parallel", "parallel"),
            vmem_limit_bytes=vmem_limit),
        cost_estimate=pl.CostEstimate(
            flops=int(flops),
            transcendentals=int(B * n_heads * Sq * Sk),
            bytes_accessed=int(bytes_accessed)),
    )(q, k, v)

    if need_weights:
        ctx, attn = out
        return ctx, attn
    return out, None


# ---------------------------------------------------------------------------
# Module wrapper
# ---------------------------------------------------------------------------
class MultiHeadAttentionPallas:
    def __init__(self, hidden_dim, n_heads, key, dropout=0.0,
                 compute_dtype=_COMPUTE_DTYPE):
        assert hidden_dim % n_heads == 0
        self.hidden_dim = hidden_dim
        self.n_heads = n_heads
        self.head_dim = hidden_dim // n_heads
        inv_scale = 1.0 / math.sqrt(float(self.head_dim))

        ks = jax.random.split(key, 8)
        bound = 1.0 / math.sqrt(float(hidden_dim))

        def init_linear(kw, kb):
            # torch nn.Linear weight is [out, in]; stored transposed as [in, out].
            w = jax.random.uniform(kw, (hidden_dim, hidden_dim), jnp.float32,
                                   -bound, bound)
            b = jax.random.uniform(kb, (hidden_dim,), jnp.float32, -bound, bound)
            return w.T, b

        wq, bq = init_linear(ks[0], ks[1])
        # Fold 1/sqrt(head_dim) into the Q projection:
        # softmax((xWq + bq)K^T / s) == softmax((x(Wq/s) + bq/s)K^T).
        self.wq, self.bq = wq * inv_scale, bq * inv_scale
        self.wk, self.bk = init_linear(ks[2], ks[3])
        self.wv, self.bv = init_linear(ks[4], ks[5])
        self.wo, self.bo = init_linear(ks[6], ks[7])
        self.dropout = dropout   # identity on attention probs at inference time

        # bf16 compute copies of the weights (halves weight HBM traffic, MXU-native).
        self.compute_dtype = compute_dtype
        self._wq = self.wq.astype(compute_dtype)
        self._wk = self.wk.astype(compute_dtype)
        self._wv = self.wv.astype(compute_dtype)
        self._wo = self.wo.astype(compute_dtype)

    def __call__(self, query, key, value, mask=None, need_weights=True):
        if mask is not None:
            # TODO(synk): masked_fill path not implemented in the Pallas kernel.
            raise NotImplementedError("attention mask is not supported")
        B, Sq, H = query.shape
        Sk = key.shape[1]
        cdt = self.compute_dtype
        out_dtype = query.dtype

        xq = query.reshape(B * Sq, H).astype(cdt)

        # Share the activation DMA whenever the source tensors are identical.
        if (query is key) and (key is value):
            Q, K, V = fused_linear(xq, (self._wq, self._wk, self._wv),
                                   (self.bq, self.bk, self.bv))
        elif key is value:
            (Q,) = fused_linear(xq, (self._wq,), (self.bq,))
            xk = key.reshape(B * Sk, H).astype(cdt)
            K, V = fused_linear(xk, (self._wk, self._wv), (self.bk, self.bv))
        else:
            (Q,) = fused_linear(xq, (self._wq,), (self.bq,))
            xk = key.reshape(B * Sk, H).astype(cdt)
            xv = value.reshape(B * Sk, H).astype(cdt)
            (K,) = fused_linear(xk, (self._wk,), (self.bk,))
            (V,) = fused_linear(xv, (self._wv,), (self.bv,))

        # Stay in [B, S, H]; heads are sliced inside the attention kernel,
        # so no XLA transposes are needed before or after it.
        Q = Q.reshape(B, Sq, H)
        K = K.reshape(B, Sk, H)
        V = V.reshape(B, Sk, H)

        ctx, attn = mha_attention(Q, K, V, n_heads=self.n_heads,
                                  need_weights=need_weights)

        (out,) = fused_linear(ctx.reshape(B * Sq, H), (self._wo,), (self.bo,),
                              out_dtype=out_dtype)
        return out.reshape(B, Sq, H), attn


# ---------------------------------------------------------------------------
# Pure-JAX f32 reference (for correctness checks; kernel compute is bf16)
# ---------------------------------------------------------------------------
def reference(mha, query, key, value):
    B, Sq, H = query.shape
    Sk = key.shape[1]
    nh, hd = mha.n_heads, mha.head_dim
    Q = query @ mha.wq + mha.bq          # 1/scale already folded into wq/bq
    K = key @ mha.wk + mha.bk
    V = value @ mha.wv + mha.bv
    Q = Q.reshape(B, Sq, nh, hd).transpose(0, 2, 1, 3)
    K = K.reshape(B, Sk, nh, hd).transpose(0, 2, 1, 3)
    V = V.reshape(B, Sk, nh, hd).transpose(0, 2, 1, 3)
    energy = jnp.einsum("bhqd,bhkd->bhqk", Q, K)
    attn = jax.nn.softmax(energy, axis=-1)
    ctx = jnp.einsum("bhqk,bhkd->bhqd", attn, V)
    x = ctx.transpose(0, 2, 1, 3).reshape(B, Sq, H)
    return x @ mha.wo + mha.bo, attn


if __name__ == "__main__":
    batch, seq, hidden, n_heads = 2, 8, 32, 4
    root = jax.random.PRNGKey(0)
    k_param, k_x, k_q, k_kv = jax.random.split(root, 4)

    mha = MultiHeadAttentionPallas(hidden, n_heads, k_param)

    # bf16 compute -> compare against the f32 reference with a bf16-appropriate tol.
    TOL = dict(atol=3e-2, rtol=3e-2)

    # Self-attention: query is key is value -> fully fused QKV projection path.
    x = jax.random.normal(k_x, (batch, seq, hidden), jnp.float32)
    out_sa, attn_sa = mha(x, x, x)
    out_sa = jax.block_until_ready(out_sa)
    attn_sa = jax.block_until_ready(attn_sa)
    ref_out_sa, ref_attn_sa = reference(mha, x, x, x)
    assert out_sa.shape == (batch, seq, hidden)
    assert out_sa.dtype == x.dtype
    assert attn_sa.shape == (batch, n_heads, seq, seq)
    assert jnp.allclose(out_sa, ref_out_sa, **TOL)
    assert jnp.allclose(attn_sa.astype(jnp.float32), ref_attn_sa, **TOL)

    # Same inputs without materializing the attention weights (fast path).
    out_nw, attn_nw = mha(x, x, x, need_weights=False)
    out_nw = jax.block_until_ready(out_nw)
    assert attn_nw is None
    assert jnp.allclose(out_nw, ref_out_sa, **TOL)

    # Cross-attention: key is value -> fused K/V projection path.
    q_in = jax.random.normal(k_q, (batch, seq, hidden), jnp.float32)
    kv_in = jax.random.normal(k_kv, (batch, seq, hidden), jnp.float32)
    out_ca, attn_ca = mha(q_in, kv_in, kv_in)
    out_ca = jax.block_until_ready(out_ca)
    attn_ca = jax.block_until_ready(attn_ca)
    ref_out_ca, ref_attn_ca = reference(mha, q_in, kv_in, kv_in)
    assert out_ca.shape == (batch, seq, hidden)
    assert attn_ca.shape == (batch, n_heads, seq, seq)
    assert jnp.allclose(out_ca, ref_out_ca, **TOL)
    assert jnp.allclose(attn_ca.astype(jnp.float32), ref_attn_ca, **TOL)

    print("KERNEL_OK")
</pallas_src>

<mosaic_0001>
module attributes {stable_mosaic.version = 11 : i64} {
  func.func @_fused_linear_kernel(%arg0: i32, %arg1: i32, %arg2: i32, %arg3: memref<16x32xbf16, #tpu.memory_space<vmem>>, %arg4: memref<32x32xbf16, #tpu.memory_space<vmem>>, %arg5: memref<32x32xbf16, #tpu.memory_space<vmem>>, %arg6: memref<32x32xbf16, #tpu.memory_space<vmem>>, %arg7: memref<1x32xf32, #tpu.memory_space<vmem>>, %arg8: memref<1x32xf32, #tpu.memory_space<vmem>>, %arg9: memref<1x32xf32, #tpu.memory_space<vmem>>, %arg10: memref<16x32xbf16, #tpu.memory_space<vmem>>, %arg11: memref<16x32xbf16, #tpu.memory_space<vmem>>, %arg12: memref<16x32xbf16, #tpu.memory_space<vmem>>, %arg13: memref<16x32xf32, #tpu.memory_space<vmem>>, %arg14: memref<16x32xf32, #tpu.memory_space<vmem>>, %arg15: memref<16x32xf32, #tpu.memory_space<vmem>>) attributes {dimension_semantics = [#tpu.dimension_semantics<parallel>, #tpu.dimension_semantics<parallel>, #tpu.dimension_semantics<arbitrary>], iteration_bounds = array<i64: 1, 1, 1>, scalar_prefetch = 0 : i64, scratch_operands = 3 : i64, tpu.core_type = #tpu.core_type<tc>, window_params = [{transform_indices = @transform_0, window_bounds = array<i64: 16, 32>}, {transform_indices = @transform_1, window_bounds = array<i64: 32, 32>}, {transform_indices = @transform_2, window_bounds = array<i64: 32, 32>}, {transform_indices = @transform_3, window_bounds = array<i64: 32, 32>}, {transform_indices = @transform_4, window_bounds = array<i64: 1, 32>}, {transform_indices = @transform_5, window_bounds = array<i64: 1, 32>}, {transform_indices = @transform_6, window_bounds = array<i64: 1, 32>}, {transform_indices = @transform_7, window_bounds = array<i64: 16, 32>}, {transform_indices = @transform_8, window_bounds = array<i64: 16, 32>}, {transform_indices = @transform_9, window_bounds = array<i64: 16, 32>}]} {
    %c0 = arith.constant 0 : index
    %c0_0 = arith.constant 0 : index
    %0 = vector.load %arg3[%c0, %c0_0] : memref<16x32xbf16, #tpu.memory_space<vmem>>, vector<16x32xbf16>
    %c0_1 = arith.constant 0 : index
    %c0_2 = arith.constant 0 : index
    %1 = vector.load %arg4[%c0_1, %c0_2] : memref<32x32xbf16, #tpu.memory_space<vmem>>, vector<32x32xbf16>
    %cst = arith.constant dense<0.000000e+00> : vector<16x32xf32>
    %2 = tpu.matmul %0, %1, %cst {dimension_numbers = #tpu.dot_dimension_numbers<[1], [0], [0], [1], [0, 0, 1, 1], [], []>} : vector<16x32xbf16>, vector<32x32xbf16>, vector<16x32xf32> -> vector<16x32xf32>
    %c0_3 = arith.constant 0 : index
    %c0_4 = arith.constant 0 : index
    %3 = vector.load %arg5[%c0_3, %c0_4] : memref<32x32xbf16, #tpu.memory_space<vmem>>, vector<32x32xbf16>
    %cst_5 = arith.constant dense<0.000000e+00> : vector<16x32xf32>
    %4 = tpu.matmul %0, %3, %cst_5 {dimension_numbers = #tpu.dot_dimension_numbers<[1], [0], [0], [1], [0, 0, 1, 1], [], []>} : vector<16x32xbf16>, vector<32x32xbf16>, vector<16x32xf32> -> vector<16x32xf32>
    %c0_6 = arith.constant 0 : index
    %c0_7 = arith.constant 0 : index
    %5 = vector.load %arg6[%c0_6, %c0_7] : memref<32x32xbf16, #tpu.memory_space<vmem>>, vector<32x32xbf16>
    %cst_8 = arith.constant dense<0.000000e+00> : vector<16x32xf32>
    %6 = tpu.matmul %0, %5, %cst_8 {dimension_numbers = #tpu.dot_dimension_numbers<[1], [0], [0], [1], [0, 0, 1, 1], [], []>} : vector<16x32xbf16>, vector<32x32xbf16>, vector<16x32xf32> -> vector<16x32xf32>
    %c0_i32 = arith.constant 0 : i32
    %7 = arith.cmpi eq, %arg2, %c0_i32 : i32
    %8 = arith.extui %7 : i1 to i32
    %c0_i32_9 = arith.constant 0 : i32
    %9 = arith.cmpi ne, %8, %c0_i32_9 : i32
    scf.if %9 {
      %c0_14 = arith.constant 0 : index
      %c0_15 = arith.constant 0 : index
      %16 = vector.load %arg13[%c0_14, %c0_15] : memref<16x32xf32, #tpu.memory_space<vmem>>, vector<16x32xf32>
      tpu.vector_store %arg13[%c0_14, %c0_15], %2 {strides = array<i32>} : memref<16x32xf32, #tpu.memory_space<vmem>>, vector<16x32xf32>,
      %c0_16 = arith.constant 0 : index
      %c0_17 = arith.constant 0 : index
      %17 = vector.load %arg14[%c0_16, %c0_17] : memref<16x32xf32, #tpu.memory_space<vmem>>, vector<16x32xf32>
      tpu.vector_store %arg14[%c0_16, %c0_17], %4 {strides = array<i32>} : memref<16x32xf32, #tpu.memory_space<vmem>>, vector<16x32xf32>,
      %c0_18 = arith.constant 0 : index
      %c0_19 = arith.constant 0 : index
      %18 = vector.load %arg15[%c0_18, %c0_19] : memref<16x32xf32, #tpu.memory_space<vmem>>, vector<16x32xf32>
      tpu.vector_store %arg15[%c0_18, %c0_19], %6 {strides = array<i32>} : memref<16x32xf32, #tpu.memory_space<vmem>>, vector<16x32xf32>,
    } else {
    }
    %c0_i32_10 = arith.constant 0 : i32
    %10 = arith.cmpi sgt, %arg2, %c0_i32_10 : i32
    %11 = arith.extui %10 : i1 to i32
    %c0_i32_11 = arith.constant 0 : i32
    %12 = arith.cmpi ne, %11, %c0_i32_11 : i32
    scf.if %12 {
      %c0_14 = arith.constant 0 : index
      %c0_15 = arith.constant 0 : index
      %16 = vector.load %arg13[%c0_14, %c0_15] : memref<16x32xf32, #tpu.memory_space<vmem>>, vector<16x32xf32>
      %17 = arith.addf %16, %2 : vector<16x32xf32>
      %c0_16 = arith.constant 0 : index
      %c0_17 = arith.constant 0 : index
      %18 = vector.load %arg13[%c0_16, %c0_17] : memref<16x32xf32, #tpu.memory_space<vmem>>, vector<16x32xf32>
      tpu.vector_store %arg13[%c0_16, %c0_17], %17 {strides = array<i32>} : memref<16x32xf32, #tpu.memory_space<vmem>>, vector<16x32xf32>,
      %c0_18 = arith.constant 0 : index
      %c0_19 = arith.constant 0 : index
      %19 = vector.load %arg14[%c0_18, %c0_19] : memref<16x32xf32, #tpu.memory_space<vmem>>, vector<16x32xf32>
      %20 = arith.addf %19, %4 : vector<16x32xf32>
      %c0_20 = arith.constant 0 : index
      %c0_21 = arith.constant 0 : index
      %21 = vector.load %arg14[%c0_20, %c0_21] : memref<16x32xf32, #tpu.memory_space<vmem>>, vector<16x32xf32>
      tpu.vector_store %arg14[%c0_20, %c0_21], %20 {strides = array<i32>} : memref<16x32xf32, #tpu.memory_space<vmem>>, vector<16x32xf32>,
      %c0_22 = arith.constant 0 : index
      %c0_23 = arith.constant 0 : index
      %22 = vector.load %arg15[%c0_22, %c0_23] : memref<16x32xf32, #tpu.memory_space<vmem>>, vector<16x32xf32>
      %23 = arith.addf %22, %6 : vector<16x32xf32>
      %c0_24 = arith.constant 0 : index
      %c0_25 = arith.constant 0 : index
      %24 = vector.load %arg15[%c0_24, %c0_25] : memref<16x32xf32, #tpu.memory_space<vmem>>, vector<16x32xf32>
      tpu.vector_store %arg15[%c0_24, %c0_25], %23 {strides = array<i32>} : memref<16x32xf32, #tpu.memory_space<vmem>>, vector<16x32xf32>,
    } else {
    }
    %c0_i32_12 = arith.constant 0 : i32
    %13 = arith.cmpi eq, %arg2, %c0_i32_12 : i32
    %14 = arith.extui %13 : i1 to i32
    %c0_i32_13 = arith.constant 0 : i32
    %15 = arith.cmpi ne, %14, %c0_i32_13 : i32
    scf.if %15 {
      %c0_14 = arith.constant 0 : index
      %c0_15 = arith.constant 0 : index
      %16 = vector.load %arg13[%c0_14, %c0_15] : memref<16x32xf32, #tpu.memory_space<vmem>>, vector<16x32xf32>
      %c0_16 = arith.constant 0 : index
      %c0_17 = arith.constant 0 : index
      %17 = vector.load %arg7[%c0_16, %c0_17] : memref<1x32xf32, #tpu.memory_space<vmem>>, vector<1x32xf32>
      %18 = vector.broadcast %17 : vector<1x32xf32> to vector<16x32xf32>
      %19 = arith.addf %16, %18 : vector<16x32xf32>
      %20 = arith.truncf %19 : vector<16x32xf32> to vector<16x32xbf16>
      %c0_18 = arith.constant 0 : index
      %c0_19 = arith.constant 0 : index
      %21 = vector.load %arg10[%c0_18, %c0_19] : memref<16x32xbf16, #tpu.memory_space<vmem>>, vector<16x32xbf16>
      tpu.vector_store %arg10[%c0_18, %c0_19], %20 {strides = array<i32>} : memref<16x32xbf16, #tpu.memory_space<vmem>>, vector<16x32xbf16>,
      %c0_20 = arith.constant 0 : index
      %c0_21 = arith.constant 0 : index
      %22 = vector.load %arg14[%c0_20, %c0_21] : memref<16x32xf32, #tpu.memory_space<vmem>>, vector<16x32xf32>
      %c0_22 = arith.constant 0 : index
      %c0_23 = arith.constant 0 : index
      %23 = vector.load %arg8[%c0_22, %c0_23] : memref<1x32xf32, #tpu.memory_space<vmem>>, vector<1x32xf32>
      %24 = vector.broadcast %23 : vector<1x32xf32> to vector<16x32xf32>
      %25 = arith.addf %22, %24 : vector<16x32xf32>
      %26 = arith.truncf %25 : vector<16x32xf32> to vector<16x32xbf16>
      %c0_24 = arith.constant 0 : index
      %c0_25 = arith.constant 0 : index
      %27 = vector.load %arg11[%c0_24, %c0_25] : memref<16x32xbf16, #tpu.memory_space<vmem>>, vector<16x32xbf16>
      tpu.vector_store %arg11[%c0_24, %c0_25], %26 {strides = array<i32>} : memref<16x32xbf16, #tpu.memory_space<vmem>>, vector<16x32xbf16>,
      %c0_26 = arith.constant 0 : index
      %c0_27 = arith.constant 0 : index
      %28 = vector.load %arg15[%c0_26, %c0_27] : memref<16x32xf32, #tpu.memory_space<vmem>>, vector<16x32xf32>
      %c0_28 = arith.constant 0 : index
      %c0_29 = arith.constant 0 : index
      %29 = vector.load %arg9[%c0_28, %c0_29] : memref<1x32xf32, #tpu.memory_space<vmem>>, vector<1x32xf32>
      %30 = vector.broadcast %29 : vector<1x32xf32> to vector<16x32xf32>
      %31 = arith.addf %28, %30 : vector<16x32xf32>
      %32 = arith.truncf %31 : vector<16x32xf32> to vector<16x32xbf16>
      %c0_30 = arith.constant 0 : index
      %c0_31 = arith.constant 0 : index
      %33 = vector.load %arg12[%c0_30, %c0_31] : memref<16x32xbf16, #tpu.memory_space<vmem>>, vector<16x32xbf16>
      tpu.vector_store %arg12[%c0_30, %c0_31], %32 {strides = array<i32>} : memref<16x32xbf16, #tpu.memory_space<vmem>>, vector<16x32xbf16>,
    } else {
    }
    return
  }
  func.func @transform_0(%arg0: i32, %arg1: i32, %arg2: i32) -> (i32, i32) {
    %c0_i32 = arith.constant 0 : i32
    return %arg0, %arg2 : i32, i32
  }
  func.func @transform_1(%arg0: i32, %arg1: i32, %arg2: i32) -> (i32, i32) {
    %c0_i32 = arith.constant 0 : i32
    return %arg2, %arg1 : i32, i32
  }
  func.func @transform_2(%arg0: i32, %arg1: i32, %arg2: i32) -> (i32, i32) {
    %c0_i32 = arith.constant 0 : i32
    return %arg2, %arg1 : i32, i32
  }
  func.func @transform_3(%arg0: i32, %arg1: i32, %arg2: i32) -> (i32, i32) {
    %c0_i32 = arith.constant 0 : i32
    return %arg2, %arg1 : i32, i32
  }
  func.func @transform_4(%arg0: i32, %arg1: i32, %arg2: i32) -> (i32, i32) {
    %c0_i32 = arith.constant 0 : i32
    %c0_i32_0 = arith.constant 0 : i32
    return %c0_i32, %arg1 : i32, i32
  }
  func.func @transform_5(%arg0: i32, %arg1: i32, %arg2: i32) -> (i32, i32) {
    %c0_i32 = arith.constant 0 : i32
    %c0_i32_0 = arith.constant 0 : i32
    return %c0_i32, %arg1 : i32, i32
  }
  func.func @transform_6(%arg0: i32, %arg1: i32, %arg2: i32) -> (i32, i32) {
    %c0_i32 = arith.constant 0 : i32
    %c0_i32_0 = arith.constant 0 : i32
    return %c0_i32, %arg1 : i32, i32
  }
  func.func @transform_7(%arg0: i32, %arg1: i32, %arg2: i32) -> (i32, i32) {
    %c0_i32 = arith.constant 0 : i32
    return %arg0, %arg1 : i32, i32
  }
  func.func @transform_8(%arg0: i32, %arg1: i32, %arg2: i32) -> (i32, i32) {
    %c0_i32 = arith.constant 0 : i32
    return %arg0, %arg1 : i32, i32
  }
  func.func @transform_9(%arg0: i32, %arg1: i32, %arg2: i32) -> (i32, i32) {
    %c0_i32 = arith.constant 0 : i32
    return %arg0, %arg1 : i32, i32
  }
}

</mosaic_0001>

<bundles_post_ra>
// kernel: tpu_custom_call.1
= control target key start
LH: loop header
LB: loop body
LE: loop exit
PB: predicated region body
PF: predicated region fallthrough
CT: control target
= control target key end

     0   :  { %15 = vsyncpa [#allocation6], 0  ;;  %s677_s0 = inlined_call_operand.hbm [shape: bf16[16,32], index: 0, kind: input, shape index: {}]   ;;  %s678_s1 = inlined_call_operand.hbm [shape: bf16[32,32], index: 1, kind: input, shape index: {}]   ;;  %s679_s2 = inlined_call_operand.hbm [shape: bf16[32,32], index: 2, kind: input, shape index: {}]   ;;  %s680_s3 = inlined_call_operand.hbm [shape: bf16[32,32], index: 3, kind: input, shape index: {}]   ;;  %s681_s4 = inlined_call_operand.vmem [shape: f32[1,32], index: 4, kind: input, shape index: {}]   ;;  %s682_s5 = inlined_call_operand.vmem [shape: f32[1,32], index: 5, kind: input, shape index: {}]   ;;  %s683_s6 = inlined_call_operand.vmem [shape: f32[1,32], index: 6, kind: input, shape index: {}]   ;;  %s684_s7 = inlined_call_operand.hbm [shape: bf16[16,32], index: 7, kind: output, shape index: {0}]   ;;  %s685_s8 = inlined_call_operand.hbm [shape: bf16[16,32], index: 8, kind: output, shape index: {1}]   ;;  %s686_s9 = inlined_call_operand.hbm [shape: bf16[16,32], index: 9, kind: output, shape index: {2}]  }
   0x1   :  { %16 = vsyncpa [#allocation9], 0 }
   0x2   :  { %17 = vsyncpa [#allocation12], 0 }
   0x3   :  { %18 = vsyncpa [#allocation7], 0 }
   0x4   :  { %19 = vsyncpa [#allocation15], 0  ;;  %s37_s11 = sshll.u32 %s678_s1, 4  ;;  %s552_s12 = smov [#allocation8]   ;;  %s38_s11 = int_to_ptr.hbm [resolvable:$true] %s37_s11 }
   0x5   :  { %s39_s13 = sshll.u32 %s552_s12, 4  ;;  %s24_s16 = sshll.u32 %s677_s0, 4  ;;  %s40_s13 = int_to_ptr.vmem [resolvable:$true] %s39_s13  ;;  %s25_s16 = int_to_ptr.hbm [resolvable:$true] %s24_s16 }
   0x6   :  { %s553_s17 = smov 64   ;;  %s554_s18 = smov 4  }
   0x7   :  { %45 = dma.hbm_to_vmem [thread:$0]  %s38_s11, 256, %s40_s13, [#allocation9], %s553_s17, %s553_s17, %s554_s18  }
   0x8   :  { %s555_s19 = smov [#allocation5]   ;;  %s50_s1 = sshll.u32 %s679_s2, 4  ;;  %s51_s1 = int_to_ptr.hbm [resolvable:$true] %s50_s1 }
   0x9   :  { %s26_s20 = sshll.u32 %s555_s19, 4  ;;  %s63_s24 = sshll.u32 %s680_s3, 4  ;;  %s27_s20 = int_to_ptr.vmem [resolvable:$true] %s26_s20  ;;  %s64_s24 = int_to_ptr.hbm [resolvable:$true] %s63_s24 }
   0xa   :  { %32 = dma.hbm_to_vmem [thread:$0]  %s25_s16, 128, %s27_s20, [#allocation6], %s553_s17, %s553_s17, %s554_s18  }
   0xb   :  { %s556_s25 = smov [#allocation10]   ;;  %s557_s27 = smov [#allocation11]  }
   0xc   :  { %s52_s26 = sshll.u32 %s556_s25, 4  ;;  %s65_s2 = sshll.u32 %s557_s27, 4  ;;  %s53_s26 = int_to_ptr.vmem [resolvable:$true] %s52_s26  ;;  %s66_s2 = int_to_ptr.vmem [resolvable:$true] %s65_s2 }
   0xd   :  { %58 = dma.hbm_to_vmem [thread:$0]  %s51_s1, 256, %s53_s26, [#allocation9], %s553_s17, %s553_s17, %s554_s18  }
   0xe   :  { %71 = dma.hbm_to_vmem [thread:$0]  %s64_s24, 256, %s66_s2, [#allocation12], %s553_s17, %s553_s17, %s554_s18  }
   0xf   :  { %542 = dma.done.wait [#allocation6], 128  }
  0x10   :  { %543 = vsyncadd [#allocation6], 4294967168 }
  0x11   :  { %544 = dma.done.wait [#allocation9], 512  }
  0x12   :  { %545 = vsyncadd [#allocation9], 4294966784 }
  0x13   :  { %546 = dma.done.wait [#allocation12], 256  }
  0x14   :  { %547 = vsyncadd [#allocation12], 4294967040  ;;  %v357_v0 = vld [vmem:[#allocation8 + $0x8] sm:$0xff]  ;;  %v359_v1 = vld [vmem:[#allocation10 + $0x8] sm:$0xff]  ;;  %vm118_vm0 = vcmask 261120   ;;  %vm241_vm1 = vcmask 257024  }
  0x15   :  { %v361_v2 = vld [vmem:[#allocation11 + $0x8] sm:$0xff]  ;;  %v356_v3 = vld [vmem:[#allocation8] sm:$0xff]  ;;  %128 = vmatpush.bf16.msra.mxu0 %v357_v0  ;;  %158 = vmatpush.bf16.msra.mxu1 %v359_v1  ;;  %v358_v4 = vld [vmem:[#allocation10] sm:$0xff]  ;;  %s274_s14 = sshll.u32 %s684_s7, 4  ;;  %s559_s15 = smov [#allocation14]   ;;  %s275_s14 = int_to_ptr.hbm [resolvable:$true] %s274_s14 }
  0x16   :  { %188 = vmatpush.bf16.msra.mxu2 %v361_v2  ;;  %v360_v5 = vld [vmem:[#allocation11] sm:$0xff]  ;;  %v355_v6 = vld [vmem:[#allocation5] sm:$0xff]  ;;  %v372_v9 = vld [vmem:[%s681_s4] ss:$0 sm:$0xff]  ;;  %s285_s16 = sshll.u32 %s559_s15, 4  ;;  %s287_s20 = sshll.u32 %s685_s8, 4  ;;  %s286_s16 = int_to_ptr.vmem [resolvable:$true] %s285_s16  ;;  %s288_s20 = int_to_ptr.hbm [resolvable:$true] %s287_s20 }
  0x17   :  { %v371_v10 = vld [vmem:[%s682_s5] ss:$0 sm:$0xff]  ;;  %s558_s5 = smov [#allocation13]   ;;  %s560_s7 = smov [#allocation16]  }
  0x18   :  { %v373_v20 = vld [vmem:[%s683_s6] ss:$0 sm:$0xff]  ;;  %s272_s11 = sshll.u32 %s558_s5, 4  ;;  %s298_s21 = sshll.u32 %s560_s7, 4  ;;  %s273_s11 = int_to_ptr.vmem [resolvable:$true] %s272_s11  ;;  %s299_s21 = int_to_ptr.vmem [resolvable:$true] %s298_s21 }
  0x19   :  { %129 = vmatpush.bf16.msra.mxu0 %v356_v3  ;;  %159 = vmatpush.bf16.msra.mxu1 %v358_v4  ;;  %s300_s0 = sshll.u32 %s686_s9, 4  ;;  %s301_s0 = int_to_ptr.hbm [resolvable:$true] %s300_s0 }
  0x1a   :  { %189 = vmatpush.bf16.msra.mxu2 %v360_v5 }
  0x1c   :  { %336 = vmatmul.msk.bf16.vlgmr.msra.gmra.mxu0 %vm118_vm0, %v355_v6  ;;  %345 = vmatmul.msk.bf16.vlgmr.msra.gmra.mxu1 %vm118_vm0, %v355_v6 }
  0x1d   :  { %354 = vmatmul.msk.bf16.vlgmr.msra.gmra.mxu2 %vm118_vm0, %v355_v6 }
  0x99   :  { %v131_v7 = vpop.f32.mrf.mxu0  ;;  %v161_v8 = vpop.f32.mrf.mxu1 }
  0x9a   :  { %200 = vst.msk [vmem:[#allocation2] sm:$0xff] %vm118_vm0, %v131_v7 }
  0x9b   :  { %202 = vst.msk [vmem:[#allocation3] sm:$0xff] %vm118_vm0, %v161_v8 }
  0xa0   :  { %v191_v11 = vpop.f32.mrf.mxu2 }
  0xa1   :  { %204 = vst.msk [vmem:[#allocation4] sm:$0xff] %vm118_vm0, %v191_v11  ;;  %v133_v12 = vpop.f32.mrf.mxu0  ;;  %v163_v13 = vpop.f32.mrf.mxu1  ;;  %v231_v14 = vld [vmem:[#allocation2] sm:$0xff] }
  0xa2   :  { %201 = vst.msk [vmem:[#allocation2 + $0x8] sm:$0xff] %vm118_vm0, %v133_v12  ;;  %v244_v15 = vld [vmem:[#allocation3] sm:$0xff]  ;;  %v237_v16 = vadd.f32 %v372_v9, %v231_v14 }
  0xa3   :  { %203 = vst.msk [vmem:[#allocation3 + $0x8] sm:$0xff] %vm118_vm0, %v163_v13  ;;  %v250_v17 = vadd.f32 %v371_v10, %v244_v15 }
  0xa4   :  { %v239_v18 = vpack.c.bf16 %v237_v16, %v237_v16 }
  0xa5   :  { %v252_v19 = vpack.c.bf16 %v250_v17, %v250_v17 }
  0xa6   :  { %242 = vst.msk [vmem:[#allocation13] sm:$0xf] %vm241_vm1, %v239_v18 }
  0xa7   :  { %254 = vst.msk [vmem:[#allocation14] sm:$0xf] %vm241_vm1, %v252_v19 }
  0xa8   :  { %v193_v21 = vpop.f32.mrf.mxu2  ;;  %v256_v22 = vld [vmem:[#allocation4] sm:$0xff] }
  0xa9   :  { %205 = vst.msk [vmem:[#allocation4 + $0x8] sm:$0xff] %vm118_vm0, %v193_v21  ;;  %v232_v23 = vld [vmem:[#allocation2 + $0x8] sm:$0xff]  ;;  %v262_v24 = vadd.f32 %v373_v20, %v256_v22 }
  0xaa   :  { %v245_v25 = vld [vmem:[#allocation3 + $0x8] sm:$0xff]  ;;  %v238_v26 = vadd.f32 %v372_v9, %v232_v23 }
  0xab   :  { %v251_v27 = vadd.f32 %v371_v10, %v245_v25  ;;  %v264_v28 = vpack.c.bf16 %v262_v24, %v262_v24 }
  0xac   :  { %v240_v29 = vpack.c.bf16 %v238_v26, %v238_v26 }
  0xad   :  { %v253_v30 = vpack.c.bf16 %v251_v27, %v251_v27  ;;  %266 = vst.msk [vmem:[#allocation16] sm:$0xf] %vm241_vm1, %v264_v28 }
  0xae   :  { %243 = vst.msk [vmem:[#allocation13 + $0x4] sm:$0xf] %vm241_vm1, %v240_v29 }
  0xaf   :  { %255 = vst.msk [vmem:[#allocation14 + $0x4] sm:$0xf] %vm241_vm1, %v253_v30  ;;  %280 = dma.vmem_to_hbm [thread:$0]  %s273_s11, 128, %s275_s14, [#allocation7], %s553_s17, %s553_s17, %s554_s18  }
  0xb0   :  { %293 = dma.vmem_to_hbm [thread:$0]  %s286_s16, 128, %s288_s20, [#allocation15], %s553_s17, %s553_s17, %s554_s18   ;;  %v257_v31 = vld [vmem:[#allocation4 + $0x8] sm:$0xff] }
  0xb1   :  { %v263_v32 = vadd.f32 %v373_v20, %v257_v31 }
  0xb3   :  { %v265_v33 = vpack.c.bf16 %v263_v32, %v263_v32 }
  0xb5   :  { %267 = vst.msk [vmem:[#allocation16 + $0x4] sm:$0xf] %vm241_vm1, %v265_v33 }
  0xb6   :  { %306 = dma.vmem_to_hbm [thread:$0]  %s299_s21, 128, %s301_s0, [#allocation15], %s553_s17, %s553_s17, %s554_s18  }
  0xb7   :  { %548 = dma.done.wait [#allocation7], 128  }
  0xb8   :  { %549 = vsyncadd [#allocation7], 4294967168 }
  0xb9   :  { %550 = dma.done.wait [#allocation15], 256  }
  0xba   :  { %551 = vsyncadd [#allocation15], 4294967040 }
  0xbb   :  { %319 = vsyncpa [#allocation6], 1 }
  0xbc   :  { %320 = vsyncpa [#allocation9], 1 }
  0xbd   :  { %321 = vsyncpa [#allocation12], 1 }
  0xbe   :  { %322 = vsyncpa [#allocation7], 1 }
  0xbf   :  { %323 = vsyncpa [#allocation15], 1 }

</bundles_post_ra>
